<compile_context>
chip_gen: v7x
topology: tpu7x:2x2x1
jax: 0.10.0
libtpu: 0.0.40
codegen_flags: <defaults>
</compile_context>

<pallas_src>
import math

import jax
import jax.numpy as jnp
from jax import lax
from jax.experimental import pallas as pl
from jax.experimental.pallas import tpu as pltpu


# ---------------------------------------------------------------------------
# Fused Pallas kernel: whole decoder in one VMEM-resident pass
# ---------------------------------------------------------------------------
def _gae_decoder_kernel(z_ref, w4_ref, w5_ref, w6_ref, adj_ref,
                        z_hat_ref, z_hat_adj_ref):
    bf16 = jnp.bfloat16
    # adj is reused by all three layers; cast to bf16 once.
    adj = adj_ref[...].astype(bf16)

    # Layer 4: z = adj @ tanh(z_igae @ W4)
    h = jnp.tanh(jnp.dot(z_ref[...].astype(bf16), w4_ref[...].astype(bf16),
                         preferred_element_type=jnp.float32))
    z = jnp.dot(adj, h.astype(bf16), preferred_element_type=jnp.float32)

    # Layer 5: z = adj @ tanh(z @ W5)
    h = jnp.tanh(jnp.dot(z.astype(bf16), w5_ref[...].astype(bf16),
                         preferred_element_type=jnp.float32))
    z = jnp.dot(adj, h.astype(bf16), preferred_element_type=jnp.float32)

    # Layer 6: z_hat = adj @ tanh(z @ W6)
    h = jnp.tanh(jnp.dot(z.astype(bf16), w6_ref[...].astype(bf16),
                         preferred_element_type=jnp.float32))
    z_hat = jnp.dot(adj, h.astype(bf16), preferred_element_type=jnp.float32)
    z_hat_ref[...] = z_hat.astype(z_hat_ref.dtype)

    # Adjacency reconstruction: sigmoid(z_hat @ z_hat.T).
    # dot_general contracting the last dims of both operands -> MXU matmul
    # with a shared contracting dim (no explicit transpose in the kernel).
    z_hat_bf = z_hat.astype(bf16)
    logits = lax.dot_general(z_hat_bf, z_hat_bf,
                             dimension_numbers=(((1,), (1,)), ((), ())),
                             preferred_element_type=jnp.float32)
    # sigmoid(x) == 0.5 * (tanh(x/2) + 1)  -> stays on the EUP slot.
    z_hat_adj_ref[...] = (0.5 * (jnp.tanh(0.5 * logits) + 1.0)).astype(
        z_hat_adj_ref.dtype)


# ---------------------------------------------------------------------------
# VMEM sizing: footprint-derived, capped by the physical VMEM per TensorCore
# ---------------------------------------------------------------------------
def _vmem_limit_bytes(n, n_z, d1, d2, n_in):
    f32, bf16 = 4, 2
    dmax = max(d1, d2, n_in)
    # Pipeline-managed blocks (inputs + outputs, f32).
    io_bytes = f32 * (n * n_z + n_z * d1 + d1 * d2 + d2 * n_in
                      + n * n          # adj
                      + n * n_in       # z_hat
                      + n * n)         # z_hat_adj
    # Kernel-materialized intermediates: bf16 adj copy, activations, logits.
    interm_bytes = bf16 * n * n + f32 * (2 * n * dmax + n * n)
    want = int(1.5 * (io_bytes + interm_bytes)) + (4 << 20)

    try:
        physical = getattr(pltpu.get_tpu_info(), "vmem_capacity_bytes",
                           64 << 20)
    except Exception:  # e.g. not running on a TPU backend at trace time
        physical = 64 << 20
    cap = int(0.80 * physical)          # headroom for compiler scratch
    # >=32 MiB (comfortable default), <=80% of physical VMEM per core:
    # ~102 MiB ceiling on v5e/v6e (128 MiB), ~51 MiB on v7x (64 MiB).
    return min(max(want, 32 << 20), cap)


# ---------------------------------------------------------------------------
# Wrapper
# ---------------------------------------------------------------------------
def gae_decoder_forward(params, z_igae, adj):
    n, n_z = z_igae.shape
    d1 = params["w4"].shape[1]
    d2 = params["w5"].shape[1]
    n_in = params["w6"].shape[1]

    flops = 2 * n * (n_z * d1 + n * d1       # layer 4
                     + d1 * d2 + n * d2      # layer 5
                     + d2 * n_in + n * n_in  # layer 6
                     + n * n_in)             # z_hat @ z_hat.T
    transcendentals = n * (d1 + d2 + n_in) + n * n
    bytes_accessed = 4 * (n * n_z + n_z * d1 + d1 * d2 + d2 * n_in
                          + n * n + n * n_in + n * n)

    return pl.pallas_call(
        _gae_decoder_kernel,
        out_shape=(
            jax.ShapeDtypeStruct((n, n_in), jnp.float32),
            jax.ShapeDtypeStruct((n, n), jnp.float32),
        ),
        in_specs=[
            pl.BlockSpec((n, n_z), lambda: (0, 0)),
            pl.BlockSpec((n_z, d1), lambda: (0, 0)),
            pl.BlockSpec((d1, d2), lambda: (0, 0)),
            pl.BlockSpec((d2, n_in), lambda: (0, 0)),
            pl.BlockSpec((n, n), lambda: (0, 0)),
        ],
        out_specs=(
            pl.BlockSpec((n, n_in), lambda: (0, 0)),
            pl.BlockSpec((n, n), lambda: (0, 0)),
        ),
        cost_estimate=pl.CostEstimate(
            flops=flops,
            transcendentals=transcendentals,
            bytes_accessed=bytes_accessed,
        ),
        compiler_params=pltpu.CompilerParams(
            vmem_limit_bytes=_vmem_limit_bytes(n, n_z, d1, d2, n_in),
        ),
    )(z_igae, params["w4"], params["w5"], params["w6"], adj)


# ---------------------------------------------------------------------------
# Parameter init (Xavier-uniform, matching torch.nn.init.xavier_uniform_)
# ---------------------------------------------------------------------------
def xavier_uniform(key, fan_in, fan_out):
    bound = math.sqrt(6.0 / (fan_in + fan_out))
    return jax.random.uniform(
        key, (fan_in, fan_out), dtype=jnp.float32, minval=-bound, maxval=bound
    )


def init_gae_decoder_params(key, gae_n_dec_1, gae_n_dec_2, n_input, n_z):
    k4, k5, k6 = jax.random.split(key, 3)
    return {
        "w4": xavier_uniform(k4, n_z, gae_n_dec_1),
        "w5": xavier_uniform(k5, gae_n_dec_1, gae_n_dec_2),
        "w6": xavier_uniform(k6, gae_n_dec_2, n_input),
    }


# ---------------------------------------------------------------------------
# Pure-JAX f32 reference for sanity check
# ---------------------------------------------------------------------------
def gae_decoder_ref(params, z_igae, adj):
    z = adj @ jnp.tanh(z_igae @ params["w4"])
    z = adj @ jnp.tanh(z @ params["w5"])
    z_hat = adj @ jnp.tanh(z @ params["w6"])
    z_hat_adj = jax.nn.sigmoid(z_hat @ z_hat.T)
    return z_hat, z_hat_adj


if __name__ == "__main__":
    # Small, lane-dense shapes consistent with the module.
    N_NODES = 128        # number of graph nodes (lane-dense adj / z_hat_adj)
    N_Z = 32             # latent dim (n_z); not lane-dense but smallest matmul
    GAE_N_DEC_1 = 128
    GAE_N_DEC_2 = 128
    N_INPUT = 128        # reconstructed feature dim (n_input)

    key = jax.random.PRNGKey(0)
    k_params, k_z, k_adj = jax.random.split(key, 3)

    params = init_gae_decoder_params(k_params, GAE_N_DEC_1, GAE_N_DEC_2,
                                     N_INPUT, N_Z)

    z_igae = jax.random.normal(k_z, (N_NODES, N_Z), dtype=jnp.float32)
    # Symmetric row-normalized dense adjacency (stand-in for the sparse adj).
    a = jax.random.uniform(k_adj, (N_NODES, N_NODES), dtype=jnp.float32)
    a = (a + a.T) * 0.5 + jnp.eye(N_NODES, dtype=jnp.float32)
    adj = a / jnp.sum(a, axis=1, keepdims=True)

    z_hat, z_hat_adj = gae_decoder_forward(params, z_igae, adj)
    jax.block_until_ready((z_hat, z_hat_adj))

    # Correctness check against the f32 reference (kernel uses bf16 MXU
    # operands with f32 accumulation -> loosened tolerances).
    z_hat_ref, z_hat_adj_ref = gae_decoder_ref(params, z_igae, adj)
    assert z_hat.shape == (N_NODES, N_INPUT)
    assert z_hat_adj.shape == (N_NODES, N_NODES)
    assert jnp.allclose(z_hat, z_hat_ref, atol=5e-2, rtol=5e-2)
    assert jnp.allclose(z_hat_adj, z_hat_adj_ref, atol=5e-2, rtol=5e-2)

    print("KERNEL_OK")
</pallas_src>

<mosaic_0001>
module attributes {stable_mosaic.version = 11 : i64} {
  func.func @_gae_decoder_kernel(%arg0: memref<128x32xf32, #tpu.memory_space<vmem>>, %arg1: memref<32x128xf32, #tpu.memory_space<vmem>>, %arg2: memref<128x128xf32, #tpu.memory_space<vmem>>, %arg3: memref<128x128xf32, #tpu.memory_space<vmem>>, %arg4: memref<128x128xf32, #tpu.memory_space<vmem>>, %arg5: memref<128x128xf32, #tpu.memory_space<vmem>>, %arg6: memref<128x128xf32, #tpu.memory_space<vmem>>) attributes {dimension_semantics = [], scalar_prefetch = 0 : i64, scratch_operands = 0 : i64, tpu.core_type = #tpu.core_type<tc>} {
    %c0 = arith.constant 0 : index
    %c0_0 = arith.constant 0 : index
    %0 = vector.load %arg4[%c0, %c0_0] : memref<128x128xf32, #tpu.memory_space<vmem>>, vector<128x128xf32>
    %1 = arith.truncf %0 : vector<128x128xf32> to vector<128x128xbf16>
    %c0_1 = arith.constant 0 : index
    %c0_2 = arith.constant 0 : index
    %2 = vector.load %arg0[%c0_1, %c0_2] : memref<128x32xf32, #tpu.memory_space<vmem>>, vector<128x32xf32>
    %3 = arith.truncf %2 : vector<128x32xf32> to vector<128x32xbf16>
    %c0_3 = arith.constant 0 : index
    %c0_4 = arith.constant 0 : index
    %4 = vector.load %arg1[%c0_3, %c0_4] : memref<32x128xf32, #tpu.memory_space<vmem>>, vector<32x128xf32>
    %5 = arith.truncf %4 : vector<32x128xf32> to vector<32x128xbf16>
    %cst = arith.constant dense<0.000000e+00> : vector<128x128xf32>
    %6 = tpu.matmul %3, %5, %cst {dimension_numbers = #tpu.dot_dimension_numbers<[1], [0], [0], [1], [0, 0, 1, 1], [], []>} : vector<128x32xbf16>, vector<32x128xbf16>, vector<128x128xf32> -> vector<128x128xf32>
    %7 = math.tanh %6 : vector<128x128xf32>
    %8 = arith.truncf %7 : vector<128x128xf32> to vector<128x128xbf16>
    %cst_5 = arith.constant dense<0.000000e+00> : vector<128x128xf32>
    %9 = tpu.matmul %1, %8, %cst_5 {dimension_numbers = #tpu.dot_dimension_numbers<[1], [0], [0], [1], [0, 0, 1, 1], [], []>} : vector<128x128xbf16>, vector<128x128xbf16>, vector<128x128xf32> -> vector<128x128xf32>
    %10 = arith.truncf %9 : vector<128x128xf32> to vector<128x128xbf16>
    %c0_6 = arith.constant 0 : index
    %c0_7 = arith.constant 0 : index
    %11 = vector.load %arg2[%c0_6, %c0_7] : memref<128x128xf32, #tpu.memory_space<vmem>>, vector<128x128xf32>
    %12 = arith.truncf %11 : vector<128x128xf32> to vector<128x128xbf16>
    %cst_8 = arith.constant dense<0.000000e+00> : vector<128x128xf32>
    %13 = tpu.matmul %10, %12, %cst_8 {dimension_numbers = #tpu.dot_dimension_numbers<[1], [0], [0], [1], [0, 0, 1, 1], [], []>} : vector<128x128xbf16>, vector<128x128xbf16>, vector<128x128xf32> -> vector<128x128xf32>
    %14 = math.tanh %13 : vector<128x128xf32>
    %15 = arith.truncf %14 : vector<128x128xf32> to vector<128x128xbf16>
    %cst_9 = arith.constant dense<0.000000e+00> : vector<128x128xf32>
    %16 = tpu.matmul %1, %15, %cst_9 {dimension_numbers = #tpu.dot_dimension_numbers<[1], [0], [0], [1], [0, 0, 1, 1], [], []>} : vector<128x128xbf16>, vector<128x128xbf16>, vector<128x128xf32> -> vector<128x128xf32>
    %17 = arith.truncf %16 : vector<128x128xf32> to vector<128x128xbf16>
    %c0_10 = arith.constant 0 : index
    %c0_11 = arith.constant 0 : index
    %18 = vector.load %arg3[%c0_10, %c0_11] : memref<128x128xf32, #tpu.memory_space<vmem>>, vector<128x128xf32>
    %19 = arith.truncf %18 : vector<128x128xf32> to vector<128x128xbf16>
    %cst_12 = arith.constant dense<0.000000e+00> : vector<128x128xf32>
    %20 = tpu.matmul %17, %19, %cst_12 {dimension_numbers = #tpu.dot_dimension_numbers<[1], [0], [0], [1], [0, 0, 1, 1], [], []>} : vector<128x128xbf16>, vector<128x128xbf16>, vector<128x128xf32> -> vector<128x128xf32>
    %21 = math.tanh %20 : vector<128x128xf32>
    %22 = arith.truncf %21 : vector<128x128xf32> to vector<128x128xbf16>
    %cst_13 = arith.constant dense<0.000000e+00> : vector<128x128xf32>
    %23 = tpu.matmul %1, %22, %cst_13 {dimension_numbers = #tpu.dot_dimension_numbers<[1], [0], [0], [1], [0, 0, 1, 1], [], []>} : vector<128x128xbf16>, vector<128x128xbf16>, vector<128x128xf32> -> vector<128x128xf32>
    %c0_14 = arith.constant 0 : index
    %c0_15 = arith.constant 0 : index
    %24 = vector.load %arg5[%c0_14, %c0_15] : memref<128x128xf32, #tpu.memory_space<vmem>>, vector<128x128xf32>
    tpu.vector_store %arg5[%c0_14, %c0_15], %23 {strides = array<i32>} : memref<128x128xf32, #tpu.memory_space<vmem>>, vector<128x128xf32>,
    %25 = arith.truncf %23 : vector<128x128xf32> to vector<128x128xbf16>
    %cst_16 = arith.constant dense<0.000000e+00> : vector<128x128xf32>
    %26 = tpu.matmul %25, %25, %cst_16 {dimension_numbers = #tpu.dot_dimension_numbers<[1], [1], [0], [0], [0, 0, 1, 0], [], []>} : vector<128x128xbf16>, vector<128x128xbf16>, vector<128x128xf32> -> vector<128x128xf32>
    %cst_17 = arith.constant 5.000000e-01 : f32
    %27 = vector.broadcast %cst_17 : f32 to vector<128x128xf32>
    %28 = arith.mulf %27, %26 : vector<128x128xf32>
    %29 = math.tanh %28 : vector<128x128xf32>
    %cst_18 = arith.constant 1.000000e+00 : f32
    %30 = vector.broadcast %cst_18 : f32 to vector<128x128xf32>
    %31 = arith.addf %29, %30 : vector<128x128xf32>
    %cst_19 = arith.constant 5.000000e-01 : f32
    %32 = vector.broadcast %cst_19 : f32 to vector<128x128xf32>
    %33 = arith.mulf %32, %31 : vector<128x128xf32>
    %c0_20 = arith.constant 0 : index
    %c0_21 = arith.constant 0 : index
    %34 = vector.load %arg6[%c0_20, %c0_21] : memref<128x128xf32, #tpu.memory_space<vmem>>, vector<128x128xf32>
    tpu.vector_store %arg6[%c0_20, %c0_21], %33 {strides = array<i32>} : memref<128x128xf32, #tpu.memory_space<vmem>>, vector<128x128xf32>,
    return
  }
}

</mosaic_0001>

<bundles_post_ra>
// kernel: tpu_custom_call.1
= control target key start
LH: loop header
LB: loop body
LE: loop exit
PB: predicated region body
PF: predicated region fallthrough
CT: control target
= control target key end

     0   :  { %12 = vsyncpa [#allocation3], 0  ;;  %s1898_s0 = inlined_call_operand.vmem [shape: f32[128,32], index: 0, kind: input, shape index: {}]   ;;  %s1899_s1 = inlined_call_operand.vmem [shape: f32[32,128], index: 1, kind: input, shape index: {}]   ;;  %s1900_s2 = inlined_call_operand.vmem [shape: f32[128,128], index: 2, kind: input, shape index: {}]   ;;  %s1901_s3 = inlined_call_operand.hbm [shape: f32[128,128], index: 3, kind: input, shape index: {}]   ;;  %s1902_s4 = inlined_call_operand.hbm [shape: f32[128,128], index: 4, kind: input, shape index: {}]   ;;  %s1903_s5 = inlined_call_operand.hbm [shape: f32[128,128], index: 5, kind: output, shape index: {0}]   ;;  %s1904_s6 = inlined_call_operand.hbm [shape: f32[128,128], index: 6, kind: output, shape index: {1}]  }
   0x1   :  { %13 = vsyncpa [#allocation6], 0 }
   0x2   :  { %14 = vsyncpa [#allocation4], 0 }
   0x3   :  { %15 = vsyncpa [#allocation9], 0  ;;  %s1641_s21 = smov [#allocation2]   ;;  %s1545_s25 = scalar_lea.hbm %s1901_s3, 2048 }
   0x4   :  { %s27_s22 = sshll.u32 %s1641_s21, 4  ;;  %p1546_p0 = scmp.ne.s32.totalorder %s1901_s3, %s1545_s25  ;;  %s28_s22 = int_to_ptr.vmem [resolvable:$true] %s27_s22 }
   0x5   :  { %p1549_p1 = scmp.lt.u32.totalorder %s1545_s25, %s1901_s3 }
   0x7   :  { %p1551_p2 = pnand %p1549_p1, %p1546_p0 }
   0x9   :  { %1554 = shalt.err (!%p1551_p2)
}
   0xa   :  { %s1555_s30 = scalar_lea.vmem %s28_s22, 2048  ;;  %p1560_p4 = scmp.lt.s32.totalorder %s28_s22, %s28_s22 }
   0xb   :  { %p1556_p3 = scmp.ne.s32.totalorder %s28_s22, %s1555_s30  ;;  %p1561_p5 = scmp.lt.s32.totalorder %s1555_s30, %s1555_s30 }
   0xd   :  { %p1562_p6 = por %p1561_p5, %p1560_p4 }
   0xf   :  { %p1563_p7 = pnand %p1562_p6, %p1556_p3 }
  0x11   :  { %1566 = shalt.err (!%p1563_p7)
}
  0x12   :  { %s1642_s7 = smov 128   ;;  %s1643_s8 = smov 8  }
  0x13   :  { %33 = dma.hbm_to_vmem [thread:$0]  %s1901_s3, 2048, %s28_s22, [#allocation3], %s1642_s7, %s1642_s7, %s1643_s8  }
  0x14   :  { %s1644_s11 = smov [#allocation5]   ;;  %s1567_s15 = scalar_lea.hbm %s1902_s4, 2048 }
  0x15   :  { %s39_s12 = sshll.u32 %s1644_s11, 4  ;;  %p1568_p8 = scmp.ne.s32.totalorder %s1902_s4, %s1567_s15  ;;  %s40_s12 = int_to_ptr.vmem [resolvable:$true] %s39_s12 }
  0x16   :  { %p1571_p9 = scmp.lt.u32.totalorder %s1567_s15, %s1902_s4 }
  0x18   :  { %p1573_p10 = pnand %p1571_p9, %p1568_p8 }
  0x1a   :  { %1576 = shalt.err (!%p1573_p10)
}
  0x1b   :  { %s1577_s20 = scalar_lea.vmem %s40_s12, 2048  ;;  %p1582_p12 = scmp.lt.s32.totalorder %s40_s12, %s40_s12 }
  0x1c   :  { %p1578_p11 = scmp.ne.s32.totalorder %s40_s12, %s1577_s20  ;;  %p1583_p13 = scmp.lt.s32.totalorder %s1577_s20, %s1577_s20 }
  0x1e   :  { %p1584_p0 = por %p1583_p13, %p1582_p12 }
  0x20   :  { %p1585_p1 = pnand %p1584_p0, %p1578_p11 }
  0x22   :  { %1588 = shalt.err (!%p1585_p1)
}
  0x23   :  { %45 = dma.hbm_to_vmem [thread:$0]  %s1902_s4, 2048, %s40_s12, [#allocation6], %s1642_s7, %s1642_s7, %s1643_s8  }
  0x24   :  { %1633 = dma.done.wait [#allocation3], 2048  }
  0x25   :  { %1634 = vsyncadd [#allocation3], 4294965248 }
  0x26   :  { %1635 = dma.done.wait [#allocation6], 2048  }
  0x27   :  { %1636 = vsyncadd [#allocation6], 4294965248  ;;  %v101_v0 = vld [vmem:[%s1899_s1] sm:$0xff]  ;;  %v102_v1 = vld [vmem:[%s1899_s1 + $0x8] sm:$0xff]  ;;  %vm107_vm0 = vcmask 261120  }
  0x28   :  { %v103_v2 = vld [vmem:[%s1899_s1 + $0x10] sm:$0xff]  ;;  %v105_v3 = vpack.c.bf16 %v102_v1, %v101_v0  ;;  %v104_v4 = vld [vmem:[%s1899_s1 + $0x18] sm:$0xff]  ;;  %v77_v5 = vld [vmem:[%s1898_s0] sm:$0xff] }
  0x29   :  { %v78_v6 = vld [vmem:[%s1898_s0 + $0x8] sm:$0xff]  ;;  %v106_v7 = vpack.c.bf16 %v104_v4, %v103_v2  ;;  %v79_v9 = vld [vmem:[%s1898_s0 + $0x10] sm:$0xff]  ;;  %v80_v10 = vld [vmem:[%s1898_s0 + $0x18] sm:$0xff] }
  0x2a   :  { %v93_v8 = vpack.c.bf16 %v78_v6, %v77_v5  ;;  %1199 = vmatprep.subr.bf16.mxu1 %v105_v3  ;;  %v81_v11 = vld [vmem:[%s1898_s0 + $0x20] sm:$0xff]  ;;  %v82_v12 = vld [vmem:[%s1898_s0 + $0x28] sm:$0xff]  ;;  %v94_v13 = vpack.c.bf16 %v80_v10, %v79_v9  ;;  %v83_v15 = vld [vmem:[%s1898_s0 + $0x30] sm:$0xff] }
  0x2b   :  { %1200 = vmatpush3.bf16.msra.mxu1 %v105_v3  ;;  %v95_v14 = vpack.c.bf16 %v82_v12, %v81_v11  ;;  %v84_v16 = vld [vmem:[%s1898_s0 + $0x38] sm:$0xff]  ;;  %v85_v17 = vld [vmem:[%s1898_s0 + $0x40] sm:$0xff]  ;;  %v86_v18 = vld [vmem:[%s1898_s0 + $0x48] sm:$0xff] }
  0x2c   :  { %1203 = vmatprep.mubr.msk.bf16.mxu1 %vm107_vm0, %v93_v8  ;;  %1201 = vmatprep.subr.bf16.mxu1 %v106_v7  ;;  %v96_v19 = vpack.c.bf16 %v84_v16, %v83_v15  ;;  %v97_v20 = vpack.c.bf16 %v86_v18, %v85_v17  ;;  %v87_v21 = vld [vmem:[%s1898_s0 + $0x50] sm:$0xff]  ;;  %v88_v22 = vld [vmem:[%s1898_s0 + $0x58] sm:$0xff]  ;;  %v89_v23 = vld [vmem:[%s1898_s0 + $0x60] sm:$0xff] }
  0x2d   :  { %v90_v24 = vld [vmem:[%s1898_s0 + $0x68] sm:$0xff]  ;;  %v98_v25 = vpack.c.bf16 %v88_v22, %v87_v21  ;;  %v91_v27 = vld [vmem:[%s1898_s0 + $0x70] sm:$0xff]  ;;  %v92_v28 = vld [vmem:[%s1898_s0 + $0x78] sm:$0xff] }
  0x2e   :  { %v99_v26 = vpack.c.bf16 %v90_v24, %v89_v23  ;;  %v100_v29 = vpack.c.bf16 %v92_v28, %v91_v27  ;;  %v53_v30 = vld [vmem:[#allocation5] sm:$0xff]  ;;  %v54_v31 = vld [vmem:[#allocation5 + $0x8] sm:$0xff]  ;;  %v360_v35 = vld [vmem:[%s1900_s2 + $0x10] sm:$0xff] }
  0x2f   :  { %1202 = vmatpush3.bf16.msra.mxu1 %v106_v7  ;;  %v1780_v32 = vpack.c.bf16 %v54_v31, %v53_v30  ;;  %v358_v33 = vld [vmem:[%s1900_s2] sm:$0xff]  ;;  %v359_v34 = vld [vmem:[%s1900_s2 + $0x8] sm:$0xff]  ;;  %v361_v37 = vld [vmem:[%s1900_s2 + $0x18] sm:$0xff] }
  0x30   :  { %v374_v36 = vpack.c.bf16 %v359_v34, %v358_v33  ;;  %v375_v38 = vpack.c.bf16 %v361_v37, %v360_v35  ;;  %v362_v39 = vld [vmem:[%s1900_s2 + $0x20] sm:$0xff]  ;;  %v363_v40 = vld [vmem:[%s1900_s2 + $0x28] sm:$0xff]  ;;  %v364_v42 = vld [vmem:[%s1900_s2 + $0x30] sm:$0xff] }
  0x31   :  { %v376_v41 = vpack.c.bf16 %v363_v40, %v362_v39  ;;  %v365_v43 = vld [vmem:[%s1900_s2 + $0x38] sm:$0xff]  ;;  %v366_v45 = vld [vmem:[%s1900_s2 + $0x40] sm:$0xff]  ;;  %v367_v46 = vld [vmem:[%s1900_s2 + $0x48] sm:$0xff] }
  0x32   :  { %1204 = vmatmul.mubr.msk.bf16.vlgmr.msra.gmra.mrb[0].mxu1 %vm107_vm0, %v94_v13  ;;  %1251 = vmatprep.subr.bf16.mxu0 %v374_v36  ;;  %v377_v44 = vpack.c.bf16 %v365_v43, %v364_v42  ;;  %v378_v47 = vpack.c.bf16 %v367_v46, %v366_v45  ;;  %v368_v48 = vld [vmem:[%s1900_s2 + $0x50] sm:$0xff]  ;;  %v369_v49 = vld [vmem:[%s1900_s2 + $0x58] sm:$0xff]  ;;  %v370_v51 = vld [vmem:[%s1900_s2 + $0x60] sm:$0xff] }
  0x33   :  { %1207 = vmatprep.mubr.msk.bf16.mxu1 %vm107_vm0, %v95_v14  ;;  %1252 = vmatpush3.bf16.msra.mxu0 %v374_v36  ;;  %v379_v50 = vpack.c.bf16 %v369_v49, %v368_v48  ;;  %v371_v52 = vld [vmem:[%s1900_s2 + $0x68] sm:$0xff]  ;;  %v55_v30 = vld [vmem:[#allocation5 + $0x10] sm:$0xff]  ;;  %v56_v31 = vld [vmem:[#allocation5 + $0x18] sm:$0xff] }
  0x34   :  { %1253 = vmatprep.subr.bf16.mxu0 %v375_v38  ;;  %v380_v53 = vpack.c.bf16 %v371_v52, %v370_v51  ;;  %v57_v33 = vld [vmem:[#allocation5 + $0x20] sm:$0xff]  ;;  %v58_v34 = vld [vmem:[#allocation5 + $0x28] sm:$0xff]  ;;  %v1825_v35 = vpack.c.bf16 %v56_v31, %v55_v30  ;;  %v59_v37 = vld [vmem:[#allocation5 + $0x30] sm:$0xff] }
  0x35   :  { %v1827_v36 = vpack.c.bf16 %v58_v34, %v57_v33  ;;  %v61_v39 = vld [vmem:[#allocation5 + $0x40] sm:$0xff]  ;;  %v62_v40 = vld [vmem:[#allocation5 + $0x48] sm:$0xff]  ;;  %v63_v43 = vld [vmem:[#allocation5 + $0x50] sm:$0xff] }
  0x36   :  { %v1833_v42 = vpack.c.bf16 %v62_v40, %v61_v39  ;;  %v65_v45 = vld [vmem:[#allocation5 + $0x60] sm:$0xff]  ;;  %v66_v46 = vld [vmem:[#allocation5 + $0x68] sm:$0xff]  ;;  %v67_v49 = vld [vmem:[#allocation5 + $0x70] sm:$0xff] }
  0x37   :  { %1254 = vmatpush3.bf16.msra.mxu0 %v375_v38  ;;  %v60_v38 = vld [vmem:[#allocation5 + $0x38] sm:$0xff]  ;;  %v1839_v48 = vpack.c.bf16 %v66_v46, %v65_v45  ;;  %v372_v52 = vld [vmem:[%s1900_s2 + $0x70] sm:$0xff]  ;;  %v620_v34 = vld [vmem:[#allocation2 + $0x60] sm:$0xff] }
  0x38   :  { %1255 = vmatprep.subr.bf16.mxu0 %v376_v41  ;;  %v618_v30 = vld [vmem:[#allocation2 + $0x50] sm:$0xff]  ;;  %v619_v31 = vld [vmem:[#allocation2 + $0x58] sm:$0xff] }
  0x39   :  { %v629_v33 = vpack.c.bf16 %v619_v31, %v618_v30 }
  0x3a   :  { %1208 = vmatmul.mubr.msk.bf16.gmra.mrb[4].mxu1 %vm107_vm0, %v96_v19 }
  0x3b   :  { %1211 = vmatprep.mubr.msk.bf16.mxu1 %vm107_vm0, %v97_v20  ;;  %1256 = vmatpush3.bf16.msra.mxu0 %v376_v41  ;;  %v1831_v41 = vpack.c.bf16 %v60_v38, %v59_v37  ;;  %v621_v37 = vld [vmem:[#allocation2 + $0x68] sm:$0xff] }
  0x3c   :  { %1257 = vmatprep.subr.bf16.mxu0 %v377_v44  ;;  %v630_v38 = vpack.c.bf16 %v621_v37, %v620_v34 }
  0x3f   :  { %1258 = vmatpush3.bf16.msra.mxu0 %v377_v44  ;;  %v64_v44 = vld [vmem:[#allocation5 + $0x58] sm:$0xff] }
  0x40   :  { %1259 = vmatprep.subr.bf16.mxu0 %v378_v47 }
  0x42   :  { %1212 = vmatmul.mubr.msk.bf16.gmra.mrb[8].mxu1 %vm107_vm0, %v98_v25 }
  0x43   :  { %1215 = vmatprep.mubr.msk.bf16.mxu1 %vm107_vm0, %v99_v26  ;;  %1260 = vmatpush3.bf16.msra.mxu0 %v378_v47  ;;  %v1837_v47 = vpack.c.bf16 %v64_v44, %v63_v43 }
  0x44   :  { %1261 = vmatprep.subr.bf16.mxu0 %v379_v50 }
  0x47   :  { %1262 = vmatpush3.bf16.msra.mxu0 %v379_v50  ;;  %v68_v50 = vld [vmem:[#allocation5 + $0x78] sm:$0xff] }
  0x48   :  { %1263 = vmatprep.subr.bf16.mxu0 %v380_v53  ;;  %v1843_v51 = vpack.c.bf16 %v68_v50, %v67_v49 }
  0x4a   :  { %1216 = vmatmul.mubr.msk.bf16.gmra.mrb[12].mxu1 %vm107_vm0, %v100_v29 }
  0x4b   :  { %1235 = vmatprep.mubr.bf16.mxu1 %v1780_v32  ;;  %1264 = vmatpush3.bf16.msra.mxu0 %v380_v53  ;;  %v373_v53 = vld [vmem:[%s1900_s2 + $0x78] sm:$0xff]  ;;  %s1645_s2 = smov [#allocation7]  }
  0x4c   :  { %s1056_s0 = sshll.u32 %s1645_s2, 4  ;;  %s1057_s0 = int_to_ptr.vmem [resolvable:$true] %s1056_s0 }
  0x4d   :  { %s1589_s19 = scalar_lea.vmem %s1057_s0, 2048  ;;  %p1594_p3 = scmp.lt.s32.totalorder %s1057_s0, %s1057_s0 }
  0x4e   :  { %p1590_p2 = scmp.ne.s32.totalorder %s1057_s0, %s1589_s19  ;;  %p1595_p4 = scmp.lt.s32.totalorder %s1589_s19, %s1589_s19 }
  0x50   :  { %p1596_p5 = por %p1595_p4, %p1594_p3 }
  0x52   :  { %p1597_p6 = pnand %p1596_p5, %p1590_p2 }
 0x105   :  { %v1205_v54 = vpop.f32.mrb[0].mxu1 }
 0x106   :  { %1417 = vtanh.f32 %v1205_v54  ;;  %v166_v55 = vpop.f32.mrb[1].mxu1  ;;  %v381_v54 = vpack.c.bf16 %v373_v53, %v372_v52 }
 0x107   :  { %1419 = vtanh.f32 %v166_v55  ;;  %v1206_v56 = vpop.f32.mrb[2].mxu1 }
 0x108   :  { %1421 = vtanh.f32 %v1206_v56  ;;  %v169_v57 = vpop.f32.mrb[3].mxu1  ;;  %1265 = vmatprep.subr.bf16.mxu0 %v381_v54 }
 0x109   :  { %1423 = vtanh.f32 %v169_v57  ;;  %1266 = vmatpush3.bf16.msra.mxu0 %v381_v54 }
 0x10d   :  { %v1209_v58 = vpop.f32.mrb[4].mxu1 }
 0x10e   :  { %1425 = vtanh.f32 %v1209_v58  ;;  %v182_v59 = vpop.f32.mrb[5].mxu1 }
 0x10f   :  { %1427 = vtanh.f32 %v182_v59  ;;  %v1210_v60 = vpop.f32.mrb[6].mxu1 }
 0x110   :  { %v1418_v61 = vpop.eup %1417  ;;  %1429 = vtanh.f32 %v1210_v60  ;;  %v185_v62 = vpop.f32.mrb[7].mxu1 }
 0x111   :  { %v1420_v63 = vpop.eup %1419  ;;  %1431 = vtanh.f32 %v185_v62 }
 0x112   :  { %v1422_v0 = vpop.eup %1421 }
 0x113   :  { %v1424_v1 = vpop.eup %1423  ;;  %v246_v2 = vpack.c.bf16 %v1422_v0, %v1418_v61 }
 0x114   :  { %v245_v3 = vpack.c.bf16 %v1424_v1, %v1420_v63 }
 0x115   :  { %v1213_v4 = vpop.f32.mrb[8].mxu1 }
 0x116   :  { %1433 = vtanh.f32 %v1213_v4  ;;  %v198_v5 = vpop.f32.mrb[9].mxu1  ;;  %1219 = vmatprep.subr.bf16.mxu1 %v245_v3 }
 0x117   :  { %1435 = vtanh.f32 %v198_v5  ;;  %v1214_v6 = vpop.f32.mrb[10].mxu1  ;;  %1220 = vmatpush3.bf16.msra.mxu1 %v245_v3 }
 0x118   :  { %v1426_v7 = vpop.eup %1425  ;;  %1437 = vtanh.f32 %v1214_v6  ;;  %v201_v8 = vpop.f32.mrb[11].mxu1  ;;  %1221 = vmatprep.subr.bf16.mxu1 %v246_v2 }
 0x119   :  { %v1428_v9 = vpop.eup %1427  ;;  %1439 = vtanh.f32 %v201_v8 }
 0x11a   :  { %v1430_v10 = vpop.eup %1429 }
 0x11b   :  { %v1432_v11 = vpop.eup %1431  ;;  %1222 = vmatpush3.bf16.msra.mxu1 %v246_v2  ;;  %v248_v12 = vpack.c.bf16 %v1430_v10, %v1426_v7 }
 0x11c   :  { %v247_v13 = vpack.c.bf16 %v1432_v11, %v1428_v9 }
 0x11d   :  { %v1217_v14 = vpop.f32.mrb[12].mxu1 }
 0x11e   :  { %1441 = vtanh.f32 %v1217_v14  ;;  %v214_v15 = vpop.f32.mrb[13].mxu1  ;;  %1223 = vmatprep.subr.bf16.mxu1 %v247_v13 }
 0x11f   :  { %1443 = vtanh.f32 %v214_v15  ;;  %v1218_v16 = vpop.f32.mrb[14].mxu1  ;;  %1224 = vmatpush3.bf16.msra.mxu1 %v247_v13  ;;  %v608_v15 = vld [vmem:[#allocation2] sm:$0xff] }
 0x120   :  { %v1434_v17 = vpop.eup %1433  ;;  %1445 = vtanh.f32 %v1218_v16  ;;  %v217_v18 = vpop.f32.mrb[15].mxu1  ;;  %1225 = vmatprep.subr.bf16.mxu1 %v248_v12  ;;  %v609_v16 = vld [vmem:[#allocation2 + $0x8] sm:$0xff] }
 0x121   :  { %v1436_v19 = vpop.eup %1435  ;;  %1447 = vtanh.f32 %v217_v18  ;;  %v624_v18 = vpack.c.bf16 %v609_v16, %v608_v15 }
 0x122   :  { %v1438_v20 = vpop.eup %1437 }
 0x123   :  { %v1440_v21 = vpop.eup %1439  ;;  %1226 = vmatpush3.bf16.msra.mxu1 %v248_v12  ;;  %v250_v22 = vpack.c.bf16 %v1438_v20, %v1434_v17  ;;  %v610_v17 = vld [vmem:[#allocation2 + $0x10] sm:$0xff]  ;;  %1315 = vmatprep.subr.bf16.mxu0 %v624_v18 }
 0x124   :  { %v249_v23 = vpack.c.bf16 %v1440_v21, %v1436_v19  ;;  %v611_v19 = vld [vmem:[#allocation2 + $0x18] sm:$0xff]  ;;  %v612_v21 = vld [vmem:[#allocation2 + $0x20] sm:$0xff] }
 0x125   :  { %v625_v20 = vpack.c.bf16 %v611_v19, %v610_v17 }
 0x126   :  { %1227 = vmatprep.subr.bf16.mxu1 %v249_v23 }
 0x127   :  { %1228 = vmatpush3.bf16.msra.mxu1 %v249_v23 }
 0x128   :  { %v1442_v24 = vpop.eup %1441  ;;  %1229 = vmatprep.subr.bf16.mxu1 %v250_v22 }
 0x129   :  { %v1444_v25 = vpop.eup %1443 }
 0x12a   :  { %v1446_v26 = vpop.eup %1445 }
 0x12b   :  { %v1448_v27 = vpop.eup %1447  ;;  %1230 = vmatpush3.bf16.msra.mxu1 %v250_v22  ;;  %v252_v28 = vpack.c.bf16 %v1446_v26, %v1442_v24  ;;  %v613_v22 = vld [vmem:[#allocation2 + $0x28] sm:$0xff]  ;;  %v614_v24 = vld [vmem:[#allocation2 + $0x30] sm:$0xff] }
 0x12c   :  { %v251_v29 = vpack.c.bf16 %v1448_v27, %v1444_v25  ;;  %v626_v23 = vpack.c.bf16 %v613_v22, %v612_v21  ;;  %v615_v25 = vld [vmem:[#allocation2 + $0x38] sm:$0xff]  ;;  %v616_v27 = vld [vmem:[#allocation2 + $0x40] sm:$0xff] }
 0x12d   :  { %v627_v26 = vpack.c.bf16 %v615_v25, %v614_v24  ;;  %v623_v21 = vld [vmem:[#allocation2 + $0x78] sm:$0xff] }
 0x12e   :  { %1231 = vmatprep.subr.bf16.mxu1 %v251_v29 }
 0x12f   :  { %1232 = vmatpush3.bf16.msra.mxu1 %v251_v29 }
 0x130   :  { %1233 = vmatprep.subr.bf16.mxu1 %v252_v28 }
 0x133   :  { %1234 = vmatpush3.bf16.msra.mxu1 %v252_v28  ;;  %v617_v28 = vld [vmem:[#allocation2 + $0x48] sm:$0xff] }
 0x134   :  { %v628_v29 = vpack.c.bf16 %v617_v28, %v616_v27 }
 0x136   :  { %1236 = vmatmul.mubr.bf16.vlgmr.msra.gmra.mrb[16].mxu1 %v1825_v35 }
 0x137   :  { %1239 = vmatprep.mubr.bf16.mxu1 %v1827_v36 }
 0x13e   :  { %1240 = vmatmul.mubr.bf16.gmra.mrb[20].mxu1 %v1831_v41 }
 0x13f   :  { %1243 = vmatprep.mubr.bf16.mxu1 %v1833_v42 }
 0x146   :  { %1244 = vmatmul.mubr.bf16.gmra.mrb[24].mxu1 %v1837_v47 }
 0x147   :  { %1247 = vmatprep.mubr.bf16.mxu1 %v1839_v48 }
 0x14e   :  { %1248 = vmatmul.mubr.bf16.gmra.mrb[28].mxu1 %v1843_v51 }
 0x14f   :  { %1299 = vmatprep.mubr.bf16.mxu1 %v1780_v32 }
 0x209   :  { %v1237_v55 = vpop.f32.mrb[16].mxu1 }
 0x20a   :  { %v287_v56 = vpop.f32.mrb[17].mxu1 }
 0x20b   :  { %v1238_v57 = vpop.f32.mrb[18].mxu1 }
 0x20c   :  { %v351_v58 = vpack.c.bf16 %v1238_v57, %v1237_v55  ;;  %v290_v59 = vpop.f32.mrb[19].mxu1 }
 0x20d   :  { %v350_v60 = vpack.c.bf16 %v290_v59, %v287_v56 }
 0x20f   :  { %1267 = vmatprep.mubr.bf16.mxu0 %v350_v60 }
 0x210   :  { %1268 = vmatmul.mubr.bf16.vlgmr.msra.gmra.mrb[0].mxu0 %v351_v58 }
 0x211   :  { %v1241_v61 = vpop.f32.mrb[20].mxu1  ;;  %1316 = vmatpush3.bf16.msra.mxu0 %v624_v18 }
 0x212   :  { %v303_v62 = vpop.f32.mrb[21].mxu1  ;;  %1317 = vmatprep.subr.bf16.mxu0 %v625_v20 }
 0x213   :  { %v1242_v63 = vpop.f32.mrb[22].mxu1 }
 0x214   :  { %v353_v0 = vpack.c.bf16 %v1242_v63, %v1241_v61  ;;  %v306_v1 = vpop.f32.mrb[23].mxu1 }
 0x215   :  { %v352_v2 = vpack.c.bf16 %v306_v1, %v303_v62  ;;  %1318 = vmatpush3.bf16.msra.mxu0 %v625_v20  ;;  %v622_v20 = vld [vmem:[#allocation2 + $0x70] sm:$0xff] }
 0x216   :  { %1319 = vmatprep.subr.bf16.mxu0 %v626_v23  ;;  %v631_v22 = vpack.c.bf16 %v623_v21, %v622_v20 }
 0x217   :  { %1271 = vmatprep.mubr.bf16.mxu0 %v352_v2 }
 0x218   :  { %1272 = vmatmul.mubr.bf16.gmra.mrb[4].mxu0 %v353_v0 }
 0x219   :  { %v1245_v3 = vpop.f32.mrb[24].mxu1  ;;  %1320 = vmatpush3.bf16.msra.mxu0 %v626_v23 }
 0x21a   :  { %v319_v4 = vpop.f32.mrb[25].mxu1  ;;  %1321 = vmatprep.subr.bf16.mxu0 %v627_v26 }
 0x21b   :  { %v1246_v5 = vpop.f32.mrb[26].mxu1 }
 0x21c   :  { %v355_v6 = vpack.c.bf16 %v1246_v5, %v1245_v3  ;;  %v322_v7 = vpop.f32.mrb[27].mxu1 }
 0x21d   :  { %v354_v8 = vpack.c.bf16 %v322_v7, %v319_v4  ;;  %1322 = vmatpush3.bf16.msra.mxu0 %v627_v26 }
 0x21e   :  { %1323 = vmatprep.subr.bf16.mxu0 %v628_v29 }
 0x21f   :  { %1275 = vmatprep.mubr.bf16.mxu0 %v354_v8 }
 0x220   :  { %1276 = vmatmul.mubr.bf16.gmra.mrb[8].mxu0 %v355_v6 }
 0x221   :  { %v1249_v9 = vpop.f32.mrb[28].mxu1  ;;  %1324 = vmatpush3.bf16.msra.mxu0 %v628_v29 }
 0x222   :  { %v335_v10 = vpop.f32.mrb[29].mxu1  ;;  %1325 = vmatprep.subr.bf16.mxu0 %v629_v33 }
 0x223   :  { %v1250_v11 = vpop.f32.mrb[30].mxu1 }
 0x224   :  { %v357_v12 = vpack.c.bf16 %v1250_v11, %v1249_v9  ;;  %v338_v13 = vpop.f32.mrb[31].mxu1 }
 0x225   :  { %v356_v14 = vpack.c.bf16 %v338_v13, %v335_v10  ;;  %1326 = vmatpush3.bf16.msra.mxu0 %v629_v33 }
 0x226   :  { %1327 = vmatprep.subr.bf16.mxu0 %v630_v38 }
 0x227   :  { %1279 = vmatprep.mubr.bf16.mxu0 %v356_v14 }
 0x228   :  { %1280 = vmatmul.mubr.bf16.gmra.mrb[12].mxu0 %v357_v12 }
 0x229   :  { %1328 = vmatpush3.bf16.msra.mxu0 %v630_v38 }
 0x22a   :  { %1329 = vmatprep.subr.bf16.mxu0 %v631_v22 }
 0x22d   :  { %1330 = vmatpush3.bf16.msra.mxu0 %v631_v22 }
 0x2e3   :  { %v1269_v39 = vpop.f32.mrb[0].mxu0 }
 0x2e4   :  { %1449 = vtanh.f32 %v1269_v39  ;;  %v416_v40 = vpop.f32.mrb[1].mxu0 }
 0x2e5   :  { %1451 = vtanh.f32 %v416_v40  ;;  %v1270_v43 = vpop.f32.mrb[2].mxu0 }
 0x2e6   :  { %1453 = vtanh.f32 %v1270_v43  ;;  %v419_v44 = vpop.f32.mrb[3].mxu0 }
 0x2e7   :  { %1455 = vtanh.f32 %v419_v44 }
 0x2eb   :  { %v1273_v45 = vpop.f32.mrb[4].mxu0 }
 0x2ec   :  { %1457 = vtanh.f32 %v1273_v45  ;;  %v432_v46 = vpop.f32.mrb[5].mxu0 }
 0x2ed   :  { %1459 = vtanh.f32 %v432_v46  ;;  %v1274_v49 = vpop.f32.mrb[6].mxu0 }
 0x2ee   :  { %v1450_v50 = vpop.eup %1449  ;;  %1461 = vtanh.f32 %v1274_v49  ;;  %v435_v52 = vpop.f32.mrb[7].mxu0 }
 0x2ef   :  { %v1452_v53 = vpop.eup %1451  ;;  %1463 = vtanh.f32 %v435_v52 }
 0x2f0   :  { %v1454_v54 = vpop.eup %1453 }
 0x2f1   :  { %v1456_v55 = vpop.eup %1455  ;;  %v496_v56 = vpack.c.bf16 %v1454_v54, %v1450_v50 }
 0x2f2   :  { %v495_v57 = vpack.c.bf16 %v1456_v55, %v1452_v53 }
 0x2f3   :  { %v1277_v58 = vpop.f32.mrb[8].mxu0 }
 0x2f4   :  { %1465 = vtanh.f32 %v1277_v58  ;;  %v448_v59 = vpop.f32.mrb[9].mxu0  ;;  %1283 = vmatprep.subr.bf16.mxu1 %v495_v57 }
 0x2f5   :  { %1467 = vtanh.f32 %v448_v59  ;;  %v1278_v60 = vpop.f32.mrb[10].mxu0  ;;  %1284 = vmatpush3.bf16.msra.mxu1 %v495_v57 }
 0x2f6   :  { %v1458_v61 = vpop.eup %1457  ;;  %1469 = vtanh.f32 %v1278_v60  ;;  %v451_v62 = vpop.f32.mrb[11].mxu0  ;;  %1285 = vmatprep.subr.bf16.mxu1 %v496_v56 }
 0x2f7   :  { %v1460_v63 = vpop.eup %1459  ;;  %1471 = vtanh.f32 %v451_v62 }
 0x2f8   :  { %v1462_v0 = vpop.eup %1461 }
 0x2f9   :  { %v1464_v1 = vpop.eup %1463  ;;  %1286 = vmatpush3.bf16.msra.mxu1 %v496_v56  ;;  %v498_v2 = vpack.c.bf16 %v1462_v0, %v1458_v61 }
 0x2fa   :  { %v497_v3 = vpack.c.bf16 %v1464_v1, %v1460_v63 }
 0x2fb   :  { %v1281_v4 = vpop.f32.mrb[12].mxu0 }
 0x2fc   :  { %1473 = vtanh.f32 %v1281_v4  ;;  %v464_v5 = vpop.f32.mrb[13].mxu0  ;;  %1287 = vmatprep.subr.bf16.mxu1 %v497_v3 }
 0x2fd   :  { %1475 = vtanh.f32 %v464_v5  ;;  %v1282_v6 = vpop.f32.mrb[14].mxu0  ;;  %1288 = vmatpush3.bf16.msra.mxu1 %v497_v3 }
 0x2fe   :  { %v1466_v7 = vpop.eup %1465  ;;  %1477 = vtanh.f32 %v1282_v6  ;;  %v467_v8 = vpop.f32.mrb[15].mxu0  ;;  %1289 = vmatprep.subr.bf16.mxu1 %v498_v2 }
 0x2ff   :  { %v1468_v9 = vpop.eup %1467  ;;  %1479 = vtanh.f32 %v467_v8 }
 0x300   :  { %v1470_v10 = vpop.eup %1469 }
 0x301   :  { %v1472_v11 = vpop.eup %1471  ;;  %1290 = vmatpush3.bf16.msra.mxu1 %v498_v2  ;;  %v500_v12 = vpack.c.bf16 %v1470_v10, %v1466_v7 }
 0x302   :  { %v499_v13 = vpack.c.bf16 %v1472_v11, %v1468_v9 }
 0x304   :  { %1291 = vmatprep.subr.bf16.mxu1 %v499_v13 }
 0x305   :  { %1292 = vmatpush3.bf16.msra.mxu1 %v499_v13 }
 0x306   :  { %v1474_v14 = vpop.eup %1473  ;;  %1293 = vmatprep.subr.bf16.mxu1 %v500_v12 }
 0x307   :  { %v1476_v15 = vpop.eup %1475 }
 0x308   :  { %v1478_v16 = vpop.eup %1477 }
 0x309   :  { %v1480_v17 = vpop.eup %1479  ;;  %1294 = vmatpush3.bf16.msra.mxu1 %v500_v12  ;;  %v502_v18 = vpack.c.bf16 %v1478_v16, %v1474_v14 }
 0x30a   :  { %v501_v19 = vpack.c.bf16 %v1480_v17, %v1476_v15 }
 0x30c   :  { %1295 = vmatprep.subr.bf16.mxu1 %v501_v19 }
 0x30d   :  { %1296 = vmatpush3.bf16.msra.mxu1 %v501_v19 }
 0x30e   :  { %1297 = vmatprep.subr.bf16.mxu1 %v502_v18 }
 0x311   :  { %1298 = vmatpush3.bf16.msra.mxu1 %v502_v18 }
 0x314   :  { %1300 = vmatmul.mubr.bf16.vlgmr.msra.gmra.mrb[32].mxu1 %v1825_v35 }
 0x315   :  { %1303 = vmatprep.mubr.bf16.mxu1 %v1827_v36 }
 0x31c   :  { %1304 = vmatmul.mubr.bf16.gmra.mrb[36].mxu1 %v1831_v41 }
 0x31d   :  { %1307 = vmatprep.mubr.bf16.mxu1 %v1833_v42 }
 0x324   :  { %1308 = vmatmul.mubr.bf16.gmra.mrb[40].mxu1 %v1837_v47 }
 0x325   :  { %1311 = vmatprep.mubr.bf16.mxu1 %v1839_v48 }
 0x32c   :  { %1312 = vmatmul.mubr.bf16.gmra.mrb[44].mxu1 %v1843_v51 }
 0x32d   :  { %1363 = vmatprep.mubr.bf16.mxu1 %v1780_v32 }
 0x3e7   :  { %v1301_v23 = vpop.f32.mrb[32].mxu1 }
 0x3e8   :  { %v537_v24 = vpop.f32.mrb[33].mxu1 }
 0x3e9   :  { %v1302_v25 = vpop.f32.mrb[34].mxu1 }
 0x3ea   :  { %v601_v26 = vpack.c.bf16 %v1302_v25, %v1301_v23  ;;  %v540_v27 = vpop.f32.mrb[35].mxu1 }
 0x3eb   :  { %v600_v28 = vpack.c.bf16 %v540_v27, %v537_v24 }
 0x3ed   :  { %1331 = vmatprep.mubr.bf16.mxu0 %v600_v28 }
 0x3ee   :  { %1332 = vmatmul.mubr.bf16.vlgmr.msra.gmra.mrb[16].mxu0 %v601_v26 }
 0x3ef   :  { %v1305_v29 = vpop.f32.mrb[36].mxu1 }
 0x3f0   :  { %v553_v30 = vpop.f32.mrb[37].mxu1 }
 0x3f1   :  { %v1306_v31 = vpop.f32.mrb[38].mxu1 }
 0x3f2   :  { %v603_v33 = vpack.c.bf16 %v1306_v31, %v1305_v29  ;;  %v556_v34 = vpop.f32.mrb[39].mxu1 }
 0x3f3   :  { %v602_v37 = vpack.c.bf16 %v556_v34, %v553_v30 }
 0x3f5   :  { %1335 = vmatprep.mubr.bf16.mxu0 %v602_v37 }
 0x3f6   :  { %1336 = vmatmul.mubr.bf16.gmra.mrb[20].mxu0 %v603_v33 }
 0x3f7   :  { %v1309_v32 = vpop.f32.mrb[40].mxu1 }
 0x3f8   :  { %v569_v38 = vpop.f32.mrb[41].mxu1 }
 0x3f9   :  { %v1310_v39 = vpop.f32.mrb[42].mxu1 }
 0x3fa   :  { %v605_v40 = vpack.c.bf16 %v1310_v39, %v1309_v32  ;;  %v572_v43 = vpop.f32.mrb[43].mxu1 }
 0x3fb   :  { %v604_v44 = vpack.c.bf16 %v572_v43, %v569_v38 }
 0x3fd   :  { %1339 = vmatprep.mubr.bf16.mxu0 %v604_v44 }
 0x3fe   :  { %1340 = vmatmul.mubr.bf16.gmra.mrb[24].mxu0 %v605_v40 }
 0x3ff   :  { %v1313_v45 = vpop.f32.mrb[44].mxu1 }
 0x400   :  { %v585_v46 = vpop.f32.mrb[45].mxu1 }
 0x401   :  { %v1314_v49 = vpop.f32.mrb[46].mxu1 }
 0x402   :  { %v607_v50 = vpack.c.bf16 %v1314_v49, %v1313_v45  ;;  %v588_v52 = vpop.f32.mrb[47].mxu1 }
 0x403   :  { %v606_v53 = vpack.c.bf16 %v588_v52, %v585_v46 }
 0x405   :  { %1343 = vmatprep.mubr.bf16.mxu0 %v606_v53 }
 0x406   :  { %1344 = vmatmul.mubr.bf16.gmra.mrb[28].mxu0 %v607_v50 }
 0x4c1   :  { %v1333_v54 = vpop.f32.mrb[16].mxu0 }
 0x4c2   :  { %1481 = vtanh.f32 %v1333_v54  ;;  %v666_v55 = vpop.f32.mrb[17].mxu0 }
 0x4c3   :  { %1483 = vtanh.f32 %v666_v55  ;;  %v1334_v56 = vpop.f32.mrb[18].mxu0 }
 0x4c4   :  { %1485 = vtanh.f32 %v1334_v56  ;;  %v669_v57 = vpop.f32.mrb[19].mxu0 }
 0x4c5   :  { %1487 = vtanh.f32 %v669_v57 }
 0x4c9   :  { %v1337_v58 = vpop.f32.mrb[20].mxu0 }
 0x4ca   :  { %1489 = vtanh.f32 %v1337_v58  ;;  %v682_v59 = vpop.f32.mrb[21].mxu0 }
 0x4cb   :  { %1491 = vtanh.f32 %v682_v59  ;;  %v1338_v60 = vpop.f32.mrb[22].mxu0 }
 0x4cc   :  { %v1482_v61 = vpop.eup %1481  ;;  %1493 = vtanh.f32 %v1338_v60  ;;  %v685_v62 = vpop.f32.mrb[23].mxu0 }
 0x4cd   :  { %v1484_v63 = vpop.eup %1483  ;;  %1495 = vtanh.f32 %v685_v62 }
 0x4ce   :  { %v1486_v0 = vpop.eup %1485 }
 0x4cf   :  { %v1488_v1 = vpop.eup %1487  ;;  %v746_v2 = vpack.c.bf16 %v1486_v0, %v1482_v61 }
 0x4d0   :  { %v745_v3 = vpack.c.bf16 %v1488_v1, %v1484_v63 }
 0x4d1   :  { %v1341_v4 = vpop.f32.mrb[24].mxu0 }
 0x4d2   :  { %1497 = vtanh.f32 %v1341_v4  ;;  %v698_v5 = vpop.f32.mrb[25].mxu0  ;;  %1347 = vmatprep.subr.bf16.mxu1 %v745_v3 }
 0x4d3   :  { %1499 = vtanh.f32 %v698_v5  ;;  %v1342_v6 = vpop.f32.mrb[26].mxu0  ;;  %1348 = vmatpush3.bf16.msra.mxu1 %v745_v3 }
 0x4d4   :  { %v1490_v7 = vpop.eup %1489  ;;  %1501 = vtanh.f32 %v1342_v6  ;;  %v701_v8 = vpop.f32.mrb[27].mxu0  ;;  %1349 = vmatprep.subr.bf16.mxu1 %v746_v2 }
 0x4d5   :  { %v1492_v9 = vpop.eup %1491  ;;  %1503 = vtanh.f32 %v701_v8 }
 0x4d6   :  { %v1494_v10 = vpop.eup %1493 }
 0x4d7   :  { %v1496_v11 = vpop.eup %1495  ;;  %1350 = vmatpush3.bf16.msra.mxu1 %v746_v2  ;;  %v748_v12 = vpack.c.bf16 %v1494_v10, %v1490_v7 }
 0x4d8   :  { %v747_v13 = vpack.c.bf16 %v1496_v11, %v1492_v9 }
 0x4d9   :  { %v1345_v14 = vpop.f32.mrb[28].mxu0 }
 0x4da   :  { %1505 = vtanh.f32 %v1345_v14  ;;  %v714_v15 = vpop.f32.mrb[29].mxu0  ;;  %1351 = vmatprep.subr.bf16.mxu1 %v747_v13 }
 0x4db   :  { %1507 = vtanh.f32 %v714_v15  ;;  %v1346_v16 = vpop.f32.mrb[30].mxu0  ;;  %1352 = vmatpush3.bf16.msra.mxu1 %v747_v13 }
 0x4dc   :  { %v1498_v17 = vpop.eup %1497  ;;  %1509 = vtanh.f32 %v1346_v16  ;;  %v717_v18 = vpop.f32.mrb[31].mxu0  ;;  %1353 = vmatprep.subr.bf16.mxu1 %v748_v12 }
 0x4dd   :  { %v1500_v19 = vpop.eup %1499  ;;  %1511 = vtanh.f32 %v717_v18 }
 0x4de   :  { %v1502_v20 = vpop.eup %1501 }
 0x4df   :  { %v1504_v21 = vpop.eup %1503  ;;  %1354 = vmatpush3.bf16.msra.mxu1 %v748_v12  ;;  %v750_v22 = vpack.c.bf16 %v1502_v20, %v1498_v17 }
 0x4e0   :  { %v749_v23 = vpack.c.bf16 %v1504_v21, %v1500_v19 }
 0x4e2   :  { %1355 = vmatprep.subr.bf16.mxu1 %v749_v23 }
 0x4e3   :  { %1356 = vmatpush3.bf16.msra.mxu1 %v749_v23 }
 0x4e4   :  { %v1506_v24 = vpop.eup %1505  ;;  %1357 = vmatprep.subr.bf16.mxu1 %v750_v22 }
 0x4e5   :  { %v1508_v25 = vpop.eup %1507 }
 0x4e6   :  { %v1510_v26 = vpop.eup %1509 }
 0x4e7   :  { %v1512_v27 = vpop.eup %1511  ;;  %1358 = vmatpush3.bf16.msra.mxu1 %v750_v22  ;;  %v752_v28 = vpack.c.bf16 %v1510_v26, %v1506_v24 }
 0x4e8   :  { %v751_v29 = vpack.c.bf16 %v1512_v27, %v1508_v25 }
 0x4ea   :  { %1359 = vmatprep.subr.bf16.mxu1 %v751_v29 }
 0x4eb   :  { %1360 = vmatpush3.bf16.msra.mxu1 %v751_v29 }
 0x4ec   :  { %1361 = vmatprep.subr.bf16.mxu1 %v752_v28 }
 0x4ef   :  { %1362 = vmatpush3.bf16.msra.mxu1 %v752_v28 }
 0x4f2   :  { %1364 = vmatmul.mubr.bf16.vlgmr.msra.gmra.mrb[48].mxu1 %v1825_v35 }
 0x4f3   :  { %1367 = vmatprep.mubr.bf16.mxu1 %v1827_v36 }
 0x4fa   :  { %1368 = vmatmul.mubr.bf16.gmra.mrb[52].mxu1 %v1831_v41 }
 0x4fb   :  { %1371 = vmatprep.mubr.bf16.mxu1 %v1833_v42 }
 0x502   :  { %1372 = vmatmul.mubr.bf16.gmra.mrb[56].mxu1 %v1837_v47 }
 0x503   :  { %1375 = vmatprep.mubr.bf16.mxu1 %v1839_v48 }
 0x50a   :  { %1376 = vmatmul.mubr.bf16.gmra.mrb[60].mxu1 %v1843_v51 }
 0x5c5   :  { %v1365_v30 = vpop.f32.mrb[48].mxu1 }
 0x5c6   :  { %852 = vst [vmem:[#allocation7 + $0x10] sm:$0xff] %v1365_v30  ;;  %v787_v31 = vpop.f32.mrb[49].mxu1 }
 0x5c7   :  { %850 = vst [vmem:[#allocation7] sm:$0xff] %v787_v31  ;;  %v1366_v33 = vpop.f32.mrb[50].mxu1 }
 0x5c8   :  { %853 = vst [vmem:[#allocation7 + $0x18] sm:$0xff] %v1366_v33  ;;  %v867_v34 = vpack.c.bf16 %v1366_v33, %v1365_v30  ;;  %v790_v35 = vpop.f32.mrb[51].mxu1 }
 0x5c9   :  { %851 = vst [vmem:[#allocation7 + $0x8] sm:$0xff] %v790_v35  ;;  %v866_v36 = vpack.c.bf16 %v790_v35, %v787_v31 }
 0x5cb   :  { %1379 = vmatprep.subr.bf16.mxu0 %v866_v36  ;;  %1395 = vmatprep.mubr.bf16.mxu0 %v866_v36 }
 0x5cc   :  { %1380 = vmatpush3.bf16.xpose.msra.mxu0 %v866_v36 }
 0x5cd   :  { %1381 = vmatprep.subr.bf16.mxu0 %v867_v34  ;;  %v1369_v41 = vpop.f32.mrb[52].mxu1 }
 0x5ce   :  { %856 = vst [vmem:[#allocation7 + $0x30] sm:$0xff] %v1369_v41  ;;  %v803_v42 = vpop.f32.mrb[53].mxu1 }
 0x5cf   :  { %854 = vst [vmem:[#allocation7 + $0x20] sm:$0xff] %v803_v42  ;;  %v1370_v47 = vpop.f32.mrb[54].mxu1 }
 0x5d0   :  { %857 = vst [vmem:[#allocation7 + $0x38] sm:$0xff] %v1370_v47  ;;  %v869_v48 = vpack.c.bf16 %v1370_v47, %v1369_v41  ;;  %v806_v51 = vpop.f32.mrb[55].mxu1 }
 0x5d1   :  { %855 = vst [vmem:[#allocation7 + $0x28] sm:$0xff] %v806_v51  ;;  %v868_v37 = vpack.c.bf16 %v806_v51, %v803_v42 }
 0x5d4   :  { %1382 = vmatpush3.bf16.xpose.msra.mxu0 %v867_v34 }
 0x5d5   :  { %1383 = vmatprep.subr.bf16.mxu0 %v868_v37  ;;  %v1373_v32 = vpop.f32.mrb[56].mxu1 }
 0x5d6   :  { %860 = vst [vmem:[#allocation7 + $0x50] sm:$0xff] %v1373_v32  ;;  %v819_v38 = vpop.f32.mrb[57].mxu1 }
 0x5d7   :  { %858 = vst [vmem:[#allocation7 + $0x40] sm:$0xff] %v819_v38  ;;  %v1374_v39 = vpop.f32.mrb[58].mxu1 }
 0x5d8   :  { %861 = vst [vmem:[#allocation7 + $0x58] sm:$0xff] %v1374_v39  ;;  %v871_v40 = vpack.c.bf16 %v1374_v39, %v1373_v32  ;;  %v822_v43 = vpop.f32.mrb[59].mxu1 }
 0x5d9   :  { %859 = vst [vmem:[#allocation7 + $0x48] sm:$0xff] %v822_v43  ;;  %v870_v44 = vpack.c.bf16 %v822_v43, %v819_v38 }
 0x5dc   :  { %1384 = vmatpush3.bf16.xpose.msra.mxu0 %v868_v37 }
 0x5dd   :  { %1385 = vmatprep.subr.bf16.mxu0 %v869_v48  ;;  %v1377_v45 = vpop.f32.mrb[60].mxu1 }
 0x5de   :  { %864 = vst [vmem:[#allocation7 + $0x70] sm:$0xff] %v1377_v45  ;;  %v835_v46 = vpop.f32.mrb[61].mxu1 }
 0x5df   :  { %862 = vst [vmem:[#allocation7 + $0x60] sm:$0xff] %v835_v46  ;;  %v1378_v49 = vpop.f32.mrb[62].mxu1 }
 0x5e0   :  { %865 = vst [vmem:[#allocation7 + $0x78] sm:$0xff] %v1378_v49  ;;  %v873_v50 = vpack.c.bf16 %v1378_v49, %v1377_v45  ;;  %v838_v52 = vpop.f32.mrb[63].mxu1 }
 0x5e1   :  { %863 = vst [vmem:[#allocation7 + $0x68] sm:$0xff] %v838_v52  ;;  %v872_v53 = vpack.c.bf16 %v838_v52, %v835_v46 }
 0x5e4   :  { %1386 = vmatpush3.bf16.xpose.msra.mxu0 %v869_v48 }
 0x5e5   :  { %1387 = vmatprep.subr.bf16.mxu0 %v870_v44 }
 0x5ec   :  { %1388 = vmatpush3.bf16.xpose.msra.mxu0 %v870_v44 }
 0x5ed   :  { %1389 = vmatprep.subr.bf16.mxu0 %v871_v40 }
 0x5f4   :  { %1390 = vmatpush3.bf16.xpose.msra.mxu0 %v871_v40 }
 0x5f5   :  { %1391 = vmatprep.subr.bf16.mxu0 %v872_v53 }
 0x5fc   :  { %1392 = vmatpush3.bf16.xpose.msra.mxu0 %v872_v53 }
 0x5fd   :  { %1393 = vmatprep.subr.bf16.mxu0 %v873_v50 }
 0x604   :  { %1394 = vmatpush3.bf16.xpose.msra.mxu0 %v873_v50 }
 0x60b   :  { %1396 = vmatmul.mubr.bf16.vlgmr.msra.gmra.mrb[32].mxu0 %v867_v34 }
 0x60c   :  { %1399 = vmatprep.mubr.bf16.mxu0 %v868_v37 }
 0x613   :  { %1400 = vmatmul.mubr.bf16.gmra.mrb[36].mxu0 %v869_v48 }
 0x614   :  { %1403 = vmatprep.mubr.bf16.mxu0 %v870_v44 }
 0x61b   :  { %1404 = vmatmul.mubr.bf16.gmra.mrb[40].mxu0 %v871_v40 }
 0x61c   :  { %1407 = vmatprep.mubr.bf16.mxu0 %v872_v53 }
 0x623   :  { %1408 = vmatmul.mubr.bf16.gmra.mrb[44].mxu0 %v873_v50 }
 0x624   :  { %1600 = shalt.err (!%p1597_p6)
}
 0x625   :  { %s1601_s21 = scalar_lea.hbm %s1903_s5, 2048 }
 0x626   :  { %p1602_p7 = scmp.ne.s32.totalorder %s1903_s5, %s1601_s21  ;;  %p1605_p8 = scmp.lt.u32.totalorder %s1601_s21, %s1903_s5 }
 0x628   :  { %p1607_p9 = pnand %p1605_p8, %p1602_p7 }
 0x62a   :  { %1610 = shalt.err (!%p1607_p9)
}
 0x62b   :  { %1062 = dma.vmem_to_hbm [thread:$0]  %s1057_s0, 2048, %s1903_s5, [#allocation4], %s1642_s7, %s1642_s7, %s1643_s8  }
 0x62c   :  { %s1646_s5 = smov [#allocation8]  }
 0x62d   :  { %s1068_s28 = sshll.u32 %s1646_s5, 4  ;;  %s1069_s28 = int_to_ptr.vmem [resolvable:$true] %s1068_s28 }
 0x62e   :  { %s1611_s29 = scalar_lea.vmem %s1069_s28, 2048  ;;  %p1616_p11 = scmp.lt.s32.totalorder %s1069_s28, %s1069_s28 }
 0x62f   :  { %p1612_p10 = scmp.ne.s32.totalorder %s1069_s28, %s1611_s29  ;;  %p1617_p12 = scmp.lt.s32.totalorder %s1611_s29, %s1611_s29 }
 0x631   :  { %p1618_p13 = por %p1617_p12, %p1616_p11 }
 0x633   :  { %p1619_p0 = pnand %p1618_p13, %p1612_p10 }
 0x6de   :  { %v1397_v54 = vpop.f32.mrb[32].mxu0 }
 0x6df   :  { %v973_v55 = vmul.f32 0.5, %v1397_v54  ;;  %v908_v56 = vpop.f32.mrb[33].mxu0 }
 0x6e0   :  { %v971_v57 = vmul.f32 0.5, %v908_v56  ;;  %v1398_v58 = vpop.f32.mrb[34].mxu0 }
 0x6e1   :  { %1513 = vtanh.f32 %v973_v55  ;;  %v974_v59 = vmul.f32 0.5, %v1398_v58  ;;  %v911_v60 = vpop.f32.mrb[35].mxu0 }
 0x6e2   :  { %1515 = vtanh.f32 %v971_v57  ;;  %v972_v61 = vmul.f32 0.5, %v911_v60 }
 0x6e3   :  { %1517 = vtanh.f32 %v974_v59 }
 0x6e4   :  { %1519 = vtanh.f32 %v972_v61 }
 0x6e6   :  { %v1401_v62 = vpop.f32.mrb[36].mxu0 }
 0x6e7   :  { %v977_v63 = vmul.f32 0.5, %v1401_v62  ;;  %v924_v0 = vpop.f32.mrb[37].mxu0 }
 0x6e8   :  { %v975_v1 = vmul.f32 0.5, %v924_v0  ;;  %v1402_v2 = vpop.f32.mrb[38].mxu0 }
 0x6e9   :  { %1521 = vtanh.f32 %v977_v63  ;;  %v978_v3 = vmul.f32 0.5, %v1402_v2  ;;  %v927_v4 = vpop.f32.mrb[39].mxu0 }
 0x6ea   :  { %1523 = vtanh.f32 %v975_v1  ;;  %v976_v5 = vmul.f32 0.5, %v927_v4 }
 0x6eb   :  { %v1514_v6 = vpop.eup %1513  ;;  %1525 = vtanh.f32 %v978_v3 }
 0x6ec   :  { %v1516_v7 = vpop.eup %1515  ;;  %v1005_v8 = vadd.f32 1.0, %v1514_v6  ;;  %1527 = vtanh.f32 %v976_v5 }
 0x6ed   :  { %v1518_v9 = vpop.eup %1517  ;;  %v1003_v10 = vadd.f32 1.0, %v1516_v7 }
 0x6ee   :  { %v1520_v11 = vpop.eup %1519  ;;  %v1021_v12 = vmul.f32 0.5, %v1005_v8  ;;  %v1006_v13 = vadd.f32 1.0, %v1518_v9  ;;  %v1405_v14 = vpop.f32.mrb[40].mxu0 }
 0x6ef   :  { %v1019_v15 = vmul.f32 0.5, %v1003_v10  ;;  %v1004_v16 = vadd.f32 1.0, %v1520_v11  ;;  %v981_v17 = vmul.f32 0.5, %v1405_v14  ;;  %v940_v18 = vpop.f32.mrb[41].mxu0 }
 0x6f0   :  { %1037 = vst [vmem:[#allocation8 + $0x10] sm:$0xff] %v1021_v12  ;;  %v1022_v19 = vmul.f32 0.5, %v1006_v13  ;;  %v979_v20 = vmul.f32 0.5, %v940_v18  ;;  %v1406_v21 = vpop.f32.mrb[42].mxu0 }
 0x6f1   :  { %1035 = vst [vmem:[#allocation8] sm:$0xff] %v1019_v15  ;;  %v1020_v22 = vmul.f32 0.5, %v1004_v16  ;;  %1529 = vtanh.f32 %v981_v17  ;;  %v982_v23 = vmul.f32 0.5, %v1406_v21  ;;  %v943_v24 = vpop.f32.mrb[43].mxu0 }
 0x6f2   :  { %1038 = vst [vmem:[#allocation8 + $0x18] sm:$0xff] %v1022_v19  ;;  %1531 = vtanh.f32 %v979_v20  ;;  %v980_v25 = vmul.f32 0.5, %v943_v24 }
 0x6f3   :  { %v1522_v26 = vpop.eup %1521  ;;  %1036 = vst [vmem:[#allocation8 + $0x8] sm:$0xff] %v1020_v22  ;;  %1533 = vtanh.f32 %v982_v23 }
 0x6f4   :  { %v1524_v27 = vpop.eup %1523  ;;  %v1009_v28 = vadd.f32 1.0, %v1522_v26  ;;  %1535 = vtanh.f32 %v980_v25 }
 0x6f5   :  { %v1526_v29 = vpop.eup %1525  ;;  %v1007_v30 = vadd.f32 1.0, %v1524_v27 }
 0x6f6   :  { %v1528_v31 = vpop.eup %1527  ;;  %v1025_v33 = vmul.f32 0.5, %v1009_v28  ;;  %v1010_v34 = vadd.f32 1.0, %v1526_v29  ;;  %v1409_v35 = vpop.f32.mrb[44].mxu0 }
 0x6f7   :  { %v1023_v36 = vmul.f32 0.5, %v1007_v30  ;;  %v1008_v41 = vadd.f32 1.0, %v1528_v31  ;;  %v985_v42 = vmul.f32 0.5, %v1409_v35  ;;  %v956_v47 = vpop.f32.mrb[45].mxu0 }
 0x6f8   :  { %1041 = vst [vmem:[#allocation8 + $0x30] sm:$0xff] %v1025_v33  ;;  %v1026_v48 = vmul.f32 0.5, %v1010_v34  ;;  %v983_v51 = vmul.f32 0.5, %v956_v47  ;;  %v1410_v37 = vpop.f32.mrb[46].mxu0 }
 0x6f9   :  { %1039 = vst [vmem:[#allocation8 + $0x20] sm:$0xff] %v1023_v36  ;;  %v1024_v32 = vmul.f32 0.5, %v1008_v41  ;;  %1537 = vtanh.f32 %v985_v42  ;;  %v986_v38 = vmul.f32 0.5, %v1410_v37  ;;  %v959_v39 = vpop.f32.mrb[47].mxu0 }
 0x6fa   :  { %1042 = vst [vmem:[#allocation8 + $0x38] sm:$0xff] %v1026_v48  ;;  %1539 = vtanh.f32 %v983_v51  ;;  %v984_v40 = vmul.f32 0.5, %v959_v39 }
 0x6fb   :  { %v1530_v43 = vpop.eup %1529  ;;  %1040 = vst [vmem:[#allocation8 + $0x28] sm:$0xff] %v1024_v32  ;;  %1541 = vtanh.f32 %v986_v38 }
 0x6fc   :  { %v1532_v44 = vpop.eup %1531  ;;  %v1013_v45 = vadd.f32 1.0, %v1530_v43  ;;  %1543 = vtanh.f32 %v984_v40 }
 0x6fd   :  { %v1534_v46 = vpop.eup %1533  ;;  %v1011_v49 = vadd.f32 1.0, %v1532_v44 }
 0x6fe   :  { %v1536_v50 = vpop.eup %1535  ;;  %v1029_v52 = vmul.f32 0.5, %v1013_v45  ;;  %v1014_v53 = vadd.f32 1.0, %v1534_v46 }
 0x6ff   :  { %v1027_v54 = vmul.f32 0.5, %v1011_v49  ;;  %v1012_v55 = vadd.f32 1.0, %v1536_v50 }
 0x700   :  { %1045 = vst [vmem:[#allocation8 + $0x50] sm:$0xff] %v1029_v52  ;;  %v1030_v56 = vmul.f32 0.5, %v1014_v53 }
 0x701   :  { %1043 = vst [vmem:[#allocation8 + $0x40] sm:$0xff] %v1027_v54  ;;  %v1028_v57 = vmul.f32 0.5, %v1012_v55 }
 0x702   :  { %1046 = vst [vmem:[#allocation8 + $0x58] sm:$0xff] %v1030_v56 }
 0x703   :  { %v1538_v58 = vpop.eup %1537  ;;  %1044 = vst [vmem:[#allocation8 + $0x48] sm:$0xff] %v1028_v57 }
 0x704   :  { %v1540_v59 = vpop.eup %1539  ;;  %v1017_v60 = vadd.f32 1.0, %v1538_v58 }
 0x705   :  { %v1542_v61 = vpop.eup %1541  ;;  %v1015_v62 = vadd.f32 1.0, %v1540_v59 }
 0x706   :  { %v1544_v63 = vpop.eup %1543  ;;  %v1033_v0 = vmul.f32 0.5, %v1017_v60  ;;  %v1018_v1 = vadd.f32 1.0, %v1542_v61 }
 0x707   :  { %v1031_v2 = vmul.f32 0.5, %v1015_v62  ;;  %v1016_v3 = vadd.f32 1.0, %v1544_v63 }
 0x708   :  { %1049 = vst [vmem:[#allocation8 + $0x70] sm:$0xff] %v1033_v0  ;;  %v1034_v4 = vmul.f32 0.5, %v1018_v1 }
 0x709   :  { %1047 = vst [vmem:[#allocation8 + $0x60] sm:$0xff] %v1031_v2  ;;  %v1032_v5 = vmul.f32 0.5, %v1016_v3 }
 0x70a   :  { %1050 = vst [vmem:[#allocation8 + $0x78] sm:$0xff] %v1034_v4 }
 0x70b   :  { %1048 = vst [vmem:[#allocation8 + $0x68] sm:$0xff] %v1032_v5 }
 0x70c   :  { %1622 = shalt.err (!%p1619_p0)
}
 0x70d   :  { %s1623_s9 = scalar_lea.hbm %s1904_s6, 2048 }
 0x70e   :  { %p1624_p1 = scmp.ne.s32.totalorder %s1904_s6, %s1623_s9  ;;  %p1627_p2 = scmp.lt.u32.totalorder %s1623_s9, %s1904_s6 }
 0x710   :  { %p1629_p3 = pnand %p1627_p2, %p1624_p1 }
 0x712   :  { %1632 = shalt.err (!%p1629_p3)
}
 0x713   :  { %1074 = dma.vmem_to_hbm [thread:$0]  %s1069_s28, 2048, %s1904_s6, [#allocation9], %s1642_s7, %s1642_s7, %s1643_s8  }
 0x714   :  { %1637 = dma.done.wait [#allocation4], 2048  }
 0x715   :  { %1638 = vsyncadd [#allocation4], 4294965248 }
 0x716   :  { %1639 = dma.done.wait [#allocation9], 2048  }
 0x717   :  { %1640 = vsyncadd [#allocation9], 4294965248 }
 0x718   :  { %1081 = vsyncpa [#allocation3], 1 }
 0x719   :  { %1082 = vsyncpa [#allocation6], 1 }
 0x71a   :  { %1083 = vsyncpa [#allocation4], 1 }
 0x71b   :  { %1084 = vsyncpa [#allocation9], 1 }

</bundles_post_ra>
